<compile_context>
chip_gen: v6e
topology: v6e:2x2x1
jax: 0.10.0
libtpu: 0.0.40
codegen_flags: <defaults>
</compile_context>

<pallas_src>
import functools

import jax
import jax.numpy as jnp
import numpy as np
from jax import lax
from jax.experimental import pallas as pl
from jax.experimental.pallas import tpu as pltpu


# -----------------------------------------------------------------------------
# Fused ResBlock kernel: Nb images per grid step, everything resident in VMEM.
# -----------------------------------------------------------------------------
def _resblock_kernel(x_ref, w_ref, b_ref, out_ref, *, H, n_convs):
    """x_ref/out_ref: (Nb*H, W*C) f32 lane-packed NHWC rows of Nb stacked images.
    w_ref: (n_convs, 3*W*C, W*C) bf16 block-Toeplitz weights (column reflect folded in).
    b_ref: (n_convs, 1, W*C) f32 biases pre-tiled over W in packed layout."""
    M, WC = x_ref.shape
    x = x_ref[...]                                            # (M, WC) f32

    # Per-image row masks, computed once per grid step. Images are stacked along the
    # sublane axis; the roll wrap-around rows are exactly the rows the fixup overwrites.
    row = lax.broadcasted_iota(jnp.int32, (M, WC), 0)
    local = row % H
    top = local == 0
    bot = local == H - 1

    h = x
    for i in range(n_convs):
        # ---- row reflect padding via XLU rolls + one-row selects (aligned tiles only) ----
        r_dn = pltpu.roll(h, 1, axis=0)        # row y -> h[y-1]   (jnp.roll convention)
        r_up = pltpu.roll(h, M - 1, axis=0)    # row y -> h[y+1]
        above = jnp.where(top, r_up, r_dn)     # reflect: local row 0 reads local row 1
        below = jnp.where(bot, r_dn, r_up)     # reflect: local row H-1 reads row H-2
        # ---- im2row patches: three aligned (M, WC) tiles at lane offsets 0/WC/2*WC ----
        patches = jnp.concatenate([above, h, below], axis=1)  # (M, 3*WC) f32
        # ---- one bf16 MXU matmul per conv, f32 accumulation; output already (x,co) packed ----
        acc = jnp.dot(patches.astype(jnp.bfloat16), w_ref[i],
                      preferred_element_type=jnp.float32)     # (M, WC) f32
        acc = acc + b_ref[i]                                  # f32 bias
        if i % 2 == 0:                                        # ReLU after 1st conv of each pair
            acc = jnp.maximum(acc, 0.0)
        h = acc
    out_ref[...] = (x + h).astype(out_ref.dtype)              # residual add, full-lane store


# -----------------------------------------------------------------------------
# Wrapper-side weight / bias packing (done ONCE per parameter set, in plain JAX).
# -----------------------------------------------------------------------------
def _pack_conv_weight(w_hwio, W):
    """(3, 3, C, C) HWIO -> (3*W*C, W*C) block-Toeplitz slab with the column (W-axis)
    reflect padding folded in:
        slab[dy*W*C + s*C + ci, x*C + co] = sum_dx [s == reflect(x+dx)] * w[dy, dx, ci, co]
    where reflect() maps padded column 0 -> 1 and W+1 -> W-2.  `patches @ slab` then
    reproduces the reflect-padded 3x3 conv with K an exact multiple of the lane width."""
    C = w_hwio.shape[-1]
    sel = np.zeros((3, W, W), np.float32)
    for dx in range(3):
        for x in range(W):
            pc = x + dx                       # padded column index in [0, W+1]
            if pc == 0:
                s = 1
            elif pc == W + 1:
                s = W - 2
            else:
                s = pc - 1
            sel[dx, s, x] = 1.0
    slab = jnp.einsum("dsx,ydic->ysixc", jnp.asarray(sel), w_hwio)   # (3, W, C, W, C)
    return slab.reshape(3 * W * C, W * C)


def pack_resblock_params(weights, biases, W):
    """weights: list of (3,3,C,C) HWIO (PyTorch OIHW -> w.transpose(2,3,1,0));
    biases: list of (C,). Returns (bf16 weight slabs, f32 packed biases)."""
    C = weights[0].shape[-1]
    w_packed = jnp.stack([_pack_conv_weight(w, W) for w in weights]).astype(jnp.bfloat16)
    b_packed = jnp.stack([jnp.tile(b, W).reshape(1, W * C) for b in biases])   # f32
    return w_packed, b_packed


# -----------------------------------------------------------------------------
# ResBlock forward:  x + Sequential([Conv3x3-reflect, ReLU, Conv3x3-reflect]*r)(x)
# -----------------------------------------------------------------------------
def _pick_images_per_block(N, H, target_rows=256):
    """Largest divisor Nb of N with Nb*H <= target_rows (fills the MXU M dimension)."""
    nb = 1
    for cand in range(1, N + 1):
        if N % cand == 0 and cand * H <= target_rows:
            nb = cand
    return nb


def resblock_forward(x_nchw, w_packed, b_packed):
    """x_nchw: (N, C, H, W) f32; (w_packed, b_packed) from pack_resblock_params."""
    N, C, H, W = x_nchw.shape
    assert H >= 2 and W >= 2, "reflect padding (pad=1) needs H, W >= 2"
    n_convs = w_packed.shape[0]
    WC = W * C
    K = 3 * WC

    nb = _pick_images_per_block(N, H)      # demo: nb*H is a multiple of 8 (H=16)
    m_blk = nb * H

    # NCHW -> NHWC -> lane-packed rows (N*H, W*C); pure layout plumbing outside the kernel.
    x_rows = jnp.transpose(x_nchw, (0, 2, 3, 1)).reshape(N * H, WC)

    kernel = functools.partial(_resblock_kernel, H=H, n_convs=n_convs)

    flops = 2 * N * H * K * WC * n_convs
    bytes_accessed = (x_rows.size * 4 + int(w_packed.size) * 2
                      + int(b_packed.size) * 4 + N * H * WC * 4)

    # Scoped-VMEM limit derived from actual block sizes (params double-buffered by default).
    param_bytes = 2 * (int(w_packed.size) * 2 + int(b_packed.size) * 4)
    act_bytes = 2 * 2 * m_blk * WC * 4                     # x & out blocks, double-buffered
    tmp_bytes = 8 * m_blk * 3 * WC * 4                     # rolls/patches/acc temporaries
    vmem_limit = int(min(128 * 1024 * 1024,
                         max(32 * 1024 * 1024, param_bytes + act_bytes + tmp_bytes)))

    out_rows = pl.pallas_call(
        kernel,
        out_shape=jax.ShapeDtypeStruct((N * H, WC), x_nchw.dtype),
        grid=(N // nb,),
        in_specs=[
            pl.BlockSpec((m_blk, WC), lambda g: (g, 0)),
            pl.BlockSpec((n_convs, K, WC), lambda g: (0, 0, 0)),   # VMEM-resident weights
            pl.BlockSpec((n_convs, 1, WC), lambda g: (0, 0, 0)),   # VMEM-resident biases
        ],
        out_specs=pl.BlockSpec((m_blk, WC), lambda g: (g, 0)),
        compiler_params=pltpu.CompilerParams(
            dimension_semantics=("parallel",),
            vmem_limit_bytes=vmem_limit,
        ),
        cost_estimate=pl.CostEstimate(
            flops=int(flops), transcendentals=0, bytes_accessed=int(bytes_accessed)),
    )(x_rows, w_packed, b_packed)

    return jnp.transpose(out_rows.reshape(N, H, W, C), (0, 3, 1, 2))  # NHWC -> NCHW


# -----------------------------------------------------------------------------
# Pure-JAX reference (for correctness check)
# -----------------------------------------------------------------------------
def _ref_conv(x_nhwc, w, b):
    xp = jnp.pad(x_nhwc, ((0, 0), (1, 1), (1, 1), (0, 0)), mode="reflect")
    out = lax.conv_general_dilated(
        xp, w, window_strides=(1, 1), padding="VALID",
        dimension_numbers=("NHWC", "HWIO", "NHWC"))
    return out + b


def resblock_reference(x_nchw, weights, biases):
    x = jnp.transpose(x_nchw, (0, 2, 3, 1))
    h = x
    for i in range(len(weights)):
        h = _ref_conv(h, weights[i], biases[i])
        if i % 2 == 0:
            h = jnp.maximum(h, 0.0)
    return jnp.transpose(x + h, (0, 3, 1, 2))


# -----------------------------------------------------------------------------
if __name__ == "__main__":
    # Small shapes consistent with the module; W*C = 128 = one vreg lane width.
    N, C, H, W = 2, 8, 16, 16
    repeats = 3
    n_convs = 2 * repeats

    key = jax.random.PRNGKey(0)
    k_x, *k_params = jax.random.split(key, 1 + 2 * n_convs)

    x = jax.random.normal(k_x, (N, C, H, W), dtype=jnp.float32)

    # Deterministic synthetic parameters (PyTorch-like uniform fan-in scaling).
    fan_in = C * 3 * 3
    bound = 1.0 / np.sqrt(fan_in)
    weights, biases = [], []
    for i in range(n_convs):
        w = jax.random.uniform(k_params[2 * i], (3, 3, C, C),
                               minval=-bound, maxval=bound, dtype=jnp.float32)
        b = jax.random.uniform(k_params[2 * i + 1], (C,),
                               minval=-bound, maxval=bound, dtype=jnp.float32)
        weights.append(w)
        biases.append(b)

    w_packed, b_packed = pack_resblock_params(weights, biases, W)   # once per param set

    fwd = jax.jit(resblock_forward)
    out = jax.block_until_ready(fwd(x, w_packed, b_packed))
    ref = jax.block_until_ready(resblock_reference(x, weights, biases))

    # bf16 MXU operands with f32 accumulation -> loosened tolerance vs. f32 reference.
    np.testing.assert_allclose(np.asarray(out), np.asarray(ref), rtol=3e-2, atol=3e-2)

    print("KERNEL_OK")
</pallas_src>

<mosaic_0001>
module attributes {stable_mosaic.version = 11 : i64} {
  func.func @_resblock_kernel(%arg0: i32, %arg1: memref<32x128xf32, #tpu.memory_space<vmem>>, %arg2: memref<6x384x128xbf16, #tpu.memory_space<vmem>>, %arg3: memref<6x1x128xf32, #tpu.memory_space<vmem>>, %arg4: memref<32x128xf32, #tpu.memory_space<vmem>>) attributes {dimension_semantics = [#tpu.dimension_semantics<parallel>], iteration_bounds = array<i64: 1>, scalar_prefetch = 0 : i64, scratch_operands = 0 : i64, tpu.core_type = #tpu.core_type<tc>, window_params = [{transform_indices = @transform_0, window_bounds = array<i64: 32, 128>}, {pipeline_mode = #tpu.pipeline_mode<synchronous>, transform_indices = @transform_1, window_bounds = array<i64: 6, 384, 128>}, {pipeline_mode = #tpu.pipeline_mode<synchronous>, transform_indices = @transform_2, window_bounds = array<i64: 6, 1, 128>}, {transform_indices = @transform_3, window_bounds = array<i64: 32, 128>}]} {
    %c0 = arith.constant 0 : index
    %c0_0 = arith.constant 0 : index
    %0 = vector.load %arg1[%c0, %c0_0] : memref<32x128xf32, #tpu.memory_space<vmem>>, vector<32x128xf32>
    %1 = tpu.iota {dimensions = array<i32: 0>} : vector<32x128xi32>
    %c16_i32 = arith.constant 16 : i32
    %c0_i32 = arith.constant 0 : i32
    %2 = arith.cmpi eq, %c16_i32, %c0_i32 : i32
    %c1_i32 = arith.constant 1 : i32
    %3 = arith.select %2, %c1_i32, %c16_i32 : i32
    %4 = vector.broadcast %3 : i32 to vector<32x128xi32>
    %5 = arith.remsi %1, %4 : vector<32x128xi32>
    %c0_i32_1 = arith.constant 0 : i32
    %6 = vector.broadcast %c0_i32_1 : i32 to vector<32x128xi32>
    %7 = arith.cmpi ne, %5, %6 : vector<32x128xi32>
    %c0_i32_2 = arith.constant 0 : i32
    %8 = vector.broadcast %c0_i32_2 : i32 to vector<32x128xi32>
    %9 = arith.cmpi slt, %5, %8 : vector<32x128xi32>
    %c0_i32_3 = arith.constant 0 : i32
    %10 = arith.cmpi slt, %3, %c0_i32_3 : i32
    %11 = vector.broadcast %10 : i1 to vector<32x128xi1>
    %12 = vector.broadcast %11 : vector<32x128xi1> to vector<32x128xi1>
    %13 = arith.xori %9, %12 : vector<32x128xi1>
    %14 = arith.andi %13, %7 : vector<32x128xi1>
    %15 = vector.broadcast %3 : i32 to vector<32x128xi32>
    %16 = arith.addi %5, %15 : vector<32x128xi32>
    %17 = arith.select %14, %16, %5 : vector<32x128xi1>, vector<32x128xi32>
    %c0_i32_4 = arith.constant 0 : i32
    %18 = vector.broadcast %c0_i32_4 : i32 to vector<32x128xi32>
    %19 = arith.cmpi eq, %17, %18 : vector<32x128xi32>
    %c15_i32 = arith.constant 15 : i32
    %20 = vector.broadcast %c15_i32 : i32 to vector<32x128xi32>
    %21 = arith.cmpi eq, %17, %20 : vector<32x128xi32>
    %c1_i32_5 = arith.constant 1 : i32
    %22 = tpu.dynamic_rotate %0 by %c1_i32_5 dim 0 : vector<32x128xf32>, i32 -> vector<32x128xf32>
    %c31_i32 = arith.constant 31 : i32
    %23 = tpu.dynamic_rotate %0 by %c31_i32 dim 0 : vector<32x128xf32>, i32 -> vector<32x128xf32>
    %24 = arith.select %19, %23, %22 : vector<32x128xi1>, vector<32x128xf32>
    %25 = arith.select %21, %22, %23 : vector<32x128xi1>, vector<32x128xf32>
    %26 = tpu.concatenate %24, %0, %25 in 1 : vector<32x128xf32>, vector<32x128xf32>, vector<32x128xf32> -> vector<32x384xf32>
    %27 = arith.truncf %26 : vector<32x384xf32> to vector<32x384xbf16>
    %c0_6 = arith.constant 0 : index
    %c0_7 = arith.constant 0 : index
    %c0_8 = arith.constant 0 : index
    %28 = vector.load %arg2[%c0_6, %c0_7, %c0_8] : memref<6x384x128xbf16, #tpu.memory_space<vmem>>, vector<1x384x128xbf16>
    %29 = vector.shape_cast %28 : vector<1x384x128xbf16> to vector<384x128xbf16>
    %cst = arith.constant dense<0.000000e+00> : vector<32x128xf32>
    %30 = tpu.matmul %27, %29, %cst {dimension_numbers = #tpu.dot_dimension_numbers<[1], [0], [0], [1], [0, 0, 1, 1], [], []>} : vector<32x384xbf16>, vector<384x128xbf16>, vector<32x128xf32> -> vector<32x128xf32>
    %c0_9 = arith.constant 0 : index
    %c0_10 = arith.constant 0 : index
    %c0_11 = arith.constant 0 : index
    %31 = vector.load %arg3[%c0_9, %c0_10, %c0_11] : memref<6x1x128xf32, #tpu.memory_space<vmem>>, vector<1x1x128xf32>
    %32 = vector.shape_cast %31 : vector<1x1x128xf32> to vector<1x128xf32>
    %33 = vector.broadcast %32 : vector<1x128xf32> to vector<32x128xf32>
    %34 = arith.addf %30, %33 : vector<32x128xf32>
    %cst_12 = arith.constant 0.000000e+00 : f32
    %35 = vector.broadcast %cst_12 : f32 to vector<32x128xf32>
    %36 = arith.maximumf %34, %35 : vector<32x128xf32>
    %c1_i32_13 = arith.constant 1 : i32
    %37 = tpu.dynamic_rotate %36 by %c1_i32_13 dim 0 : vector<32x128xf32>, i32 -> vector<32x128xf32>
    %c31_i32_14 = arith.constant 31 : i32
    %38 = tpu.dynamic_rotate %36 by %c31_i32_14 dim 0 : vector<32x128xf32>, i32 -> vector<32x128xf32>
    %39 = arith.select %19, %38, %37 : vector<32x128xi1>, vector<32x128xf32>
    %40 = arith.select %21, %37, %38 : vector<32x128xi1>, vector<32x128xf32>
    %41 = tpu.concatenate %39, %36, %40 in 1 : vector<32x128xf32>, vector<32x128xf32>, vector<32x128xf32> -> vector<32x384xf32>
    %42 = arith.truncf %41 : vector<32x384xf32> to vector<32x384xbf16>
    %c1 = arith.constant 1 : index
    %c0_15 = arith.constant 0 : index
    %c0_16 = arith.constant 0 : index
    %43 = vector.load %arg2[%c1, %c0_15, %c0_16] : memref<6x384x128xbf16, #tpu.memory_space<vmem>>, vector<1x384x128xbf16>
    %44 = vector.shape_cast %43 : vector<1x384x128xbf16> to vector<384x128xbf16>
    %cst_17 = arith.constant dense<0.000000e+00> : vector<32x128xf32>
    %45 = tpu.matmul %42, %44, %cst_17 {dimension_numbers = #tpu.dot_dimension_numbers<[1], [0], [0], [1], [0, 0, 1, 1], [], []>} : vector<32x384xbf16>, vector<384x128xbf16>, vector<32x128xf32> -> vector<32x128xf32>
    %c1_18 = arith.constant 1 : index
    %c0_19 = arith.constant 0 : index
    %c0_20 = arith.constant 0 : index
    %46 = vector.load %arg3[%c1_18, %c0_19, %c0_20] : memref<6x1x128xf32, #tpu.memory_space<vmem>>, vector<1x1x128xf32>
    %47 = vector.shape_cast %46 : vector<1x1x128xf32> to vector<1x128xf32>
    %48 = vector.broadcast %47 : vector<1x128xf32> to vector<32x128xf32>
    %49 = arith.addf %45, %48 : vector<32x128xf32>
    %c1_i32_21 = arith.constant 1 : i32
    %50 = tpu.dynamic_rotate %49 by %c1_i32_21 dim 0 : vector<32x128xf32>, i32 -> vector<32x128xf32>
    %c31_i32_22 = arith.constant 31 : i32
    %51 = tpu.dynamic_rotate %49 by %c31_i32_22 dim 0 : vector<32x128xf32>, i32 -> vector<32x128xf32>
    %52 = arith.select %19, %51, %50 : vector<32x128xi1>, vector<32x128xf32>
    %53 = arith.select %21, %50, %51 : vector<32x128xi1>, vector<32x128xf32>
    %54 = tpu.concatenate %52, %49, %53 in 1 : vector<32x128xf32>, vector<32x128xf32>, vector<32x128xf32> -> vector<32x384xf32>
    %55 = arith.truncf %54 : vector<32x384xf32> to vector<32x384xbf16>
    %c2 = arith.constant 2 : index
    %c0_23 = arith.constant 0 : index
    %c0_24 = arith.constant 0 : index
    %56 = vector.load %arg2[%c2, %c0_23, %c0_24] : memref<6x384x128xbf16, #tpu.memory_space<vmem>>, vector<1x384x128xbf16>
    %57 = vector.shape_cast %56 : vector<1x384x128xbf16> to vector<384x128xbf16>
    %cst_25 = arith.constant dense<0.000000e+00> : vector<32x128xf32>
    %58 = tpu.matmul %55, %57, %cst_25 {dimension_numbers = #tpu.dot_dimension_numbers<[1], [0], [0], [1], [0, 0, 1, 1], [], []>} : vector<32x384xbf16>, vector<384x128xbf16>, vector<32x128xf32> -> vector<32x128xf32>
    %c2_26 = arith.constant 2 : index
    %c0_27 = arith.constant 0 : index
    %c0_28 = arith.constant 0 : index
    %59 = vector.load %arg3[%c2_26, %c0_27, %c0_28] : memref<6x1x128xf32, #tpu.memory_space<vmem>>, vector<1x1x128xf32>
    %60 = vector.shape_cast %59 : vector<1x1x128xf32> to vector<1x128xf32>
    %61 = vector.broadcast %60 : vector<1x128xf32> to vector<32x128xf32>
    %62 = arith.addf %58, %61 : vector<32x128xf32>
    %cst_29 = arith.constant 0.000000e+00 : f32
    %63 = vector.broadcast %cst_29 : f32 to vector<32x128xf32>
    %64 = arith.maximumf %62, %63 : vector<32x128xf32>
    %c1_i32_30 = arith.constant 1 : i32
    %65 = tpu.dynamic_rotate %64 by %c1_i32_30 dim 0 : vector<32x128xf32>, i32 -> vector<32x128xf32>
    %c31_i32_31 = arith.constant 31 : i32
    %66 = tpu.dynamic_rotate %64 by %c31_i32_31 dim 0 : vector<32x128xf32>, i32 -> vector<32x128xf32>
    %67 = arith.select %19, %66, %65 : vector<32x128xi1>, vector<32x128xf32>
    %68 = arith.select %21, %65, %66 : vector<32x128xi1>, vector<32x128xf32>
    %69 = tpu.concatenate %67, %64, %68 in 1 : vector<32x128xf32>, vector<32x128xf32>, vector<32x128xf32> -> vector<32x384xf32>
    %70 = arith.truncf %69 : vector<32x384xf32> to vector<32x384xbf16>
    %c3 = arith.constant 3 : index
    %c0_32 = arith.constant 0 : index
    %c0_33 = arith.constant 0 : index
    %71 = vector.load %arg2[%c3, %c0_32, %c0_33] : memref<6x384x128xbf16, #tpu.memory_space<vmem>>, vector<1x384x128xbf16>
    %72 = vector.shape_cast %71 : vector<1x384x128xbf16> to vector<384x128xbf16>
    %cst_34 = arith.constant dense<0.000000e+00> : vector<32x128xf32>
    %73 = tpu.matmul %70, %72, %cst_34 {dimension_numbers = #tpu.dot_dimension_numbers<[1], [0], [0], [1], [0, 0, 1, 1], [], []>} : vector<32x384xbf16>, vector<384x128xbf16>, vector<32x128xf32> -> vector<32x128xf32>
    %c3_35 = arith.constant 3 : index
    %c0_36 = arith.constant 0 : index
    %c0_37 = arith.constant 0 : index
    %74 = vector.load %arg3[%c3_35, %c0_36, %c0_37] : memref<6x1x128xf32, #tpu.memory_space<vmem>>, vector<1x1x128xf32>
    %75 = vector.shape_cast %74 : vector<1x1x128xf32> to vector<1x128xf32>
    %76 = vector.broadcast %75 : vector<1x128xf32> to vector<32x128xf32>
    %77 = arith.addf %73, %76 : vector<32x128xf32>
    %c1_i32_38 = arith.constant 1 : i32
    %78 = tpu.dynamic_rotate %77 by %c1_i32_38 dim 0 : vector<32x128xf32>, i32 -> vector<32x128xf32>
    %c31_i32_39 = arith.constant 31 : i32
    %79 = tpu.dynamic_rotate %77 by %c31_i32_39 dim 0 : vector<32x128xf32>, i32 -> vector<32x128xf32>
    %80 = arith.select %19, %79, %78 : vector<32x128xi1>, vector<32x128xf32>
    %81 = arith.select %21, %78, %79 : vector<32x128xi1>, vector<32x128xf32>
    %82 = tpu.concatenate %80, %77, %81 in 1 : vector<32x128xf32>, vector<32x128xf32>, vector<32x128xf32> -> vector<32x384xf32>
    %83 = arith.truncf %82 : vector<32x384xf32> to vector<32x384xbf16>
    %c4 = arith.constant 4 : index
    %c0_40 = arith.constant 0 : index
    %c0_41 = arith.constant 0 : index
    %84 = vector.load %arg2[%c4, %c0_40, %c0_41] : memref<6x384x128xbf16, #tpu.memory_space<vmem>>, vector<1x384x128xbf16>
    %85 = vector.shape_cast %84 : vector<1x384x128xbf16> to vector<384x128xbf16>
    %cst_42 = arith.constant dense<0.000000e+00> : vector<32x128xf32>
    %86 = tpu.matmul %83, %85, %cst_42 {dimension_numbers = #tpu.dot_dimension_numbers<[1], [0], [0], [1], [0, 0, 1, 1], [], []>} : vector<32x384xbf16>, vector<384x128xbf16>, vector<32x128xf32> -> vector<32x128xf32>
    %c4_43 = arith.constant 4 : index
    %c0_44 = arith.constant 0 : index
    %c0_45 = arith.constant 0 : index
    %87 = vector.load %arg3[%c4_43, %c0_44, %c0_45] : memref<6x1x128xf32, #tpu.memory_space<vmem>>, vector<1x1x128xf32>
    %88 = vector.shape_cast %87 : vector<1x1x128xf32> to vector<1x128xf32>
    %89 = vector.broadcast %88 : vector<1x128xf32> to vector<32x128xf32>
    %90 = arith.addf %86, %89 : vector<32x128xf32>
    %cst_46 = arith.constant 0.000000e+00 : f32
    %91 = vector.broadcast %cst_46 : f32 to vector<32x128xf32>
    %92 = arith.maximumf %90, %91 : vector<32x128xf32>
    %c1_i32_47 = arith.constant 1 : i32
    %93 = tpu.dynamic_rotate %92 by %c1_i32_47 dim 0 : vector<32x128xf32>, i32 -> vector<32x128xf32>
    %c31_i32_48 = arith.constant 31 : i32
    %94 = tpu.dynamic_rotate %92 by %c31_i32_48 dim 0 : vector<32x128xf32>, i32 -> vector<32x128xf32>
    %95 = arith.select %19, %94, %93 : vector<32x128xi1>, vector<32x128xf32>
    %96 = arith.select %21, %93, %94 : vector<32x128xi1>, vector<32x128xf32>
    %97 = tpu.concatenate %95, %92, %96 in 1 : vector<32x128xf32>, vector<32x128xf32>, vector<32x128xf32> -> vector<32x384xf32>
    %98 = arith.truncf %97 : vector<32x384xf32> to vector<32x384xbf16>
    %c5 = arith.constant 5 : index
    %c0_49 = arith.constant 0 : index
    %c0_50 = arith.constant 0 : index
    %99 = vector.load %arg2[%c5, %c0_49, %c0_50] : memref<6x384x128xbf16, #tpu.memory_space<vmem>>, vector<1x384x128xbf16>
    %100 = vector.shape_cast %99 : vector<1x384x128xbf16> to vector<384x128xbf16>
    %cst_51 = arith.constant dense<0.000000e+00> : vector<32x128xf32>
    %101 = tpu.matmul %98, %100, %cst_51 {dimension_numbers = #tpu.dot_dimension_numbers<[1], [0], [0], [1], [0, 0, 1, 1], [], []>} : vector<32x384xbf16>, vector<384x128xbf16>, vector<32x128xf32> -> vector<32x128xf32>
    %c5_52 = arith.constant 5 : index
    %c0_53 = arith.constant 0 : index
    %c0_54 = arith.constant 0 : index
    %102 = vector.load %arg3[%c5_52, %c0_53, %c0_54] : memref<6x1x128xf32, #tpu.memory_space<vmem>>, vector<1x1x128xf32>
    %103 = vector.shape_cast %102 : vector<1x1x128xf32> to vector<1x128xf32>
    %104 = vector.broadcast %103 : vector<1x128xf32> to vector<32x128xf32>
    %105 = arith.addf %101, %104 : vector<32x128xf32>
    %106 = arith.addf %0, %105 : vector<32x128xf32>
    %c0_55 = arith.constant 0 : index
    %c0_56 = arith.constant 0 : index
    %107 = vector.load %arg4[%c0_55, %c0_56] : memref<32x128xf32, #tpu.memory_space<vmem>>, vector<32x128xf32>
    tpu.vector_store %arg4[%c0_55, %c0_56], %106 {strides = array<i32>} : memref<32x128xf32, #tpu.memory_space<vmem>>, vector<32x128xf32>,
    return
  }
  func.func @transform_0(%arg0: i32) -> (i32, i32) {
    %c0_i32 = arith.constant 0 : i32
    %c0_i32_0 = arith.constant 0 : i32
    return %arg0, %c0_i32 : i32, i32
  }
  func.func @transform_1(%arg0: i32) -> (i32, i32, i32) {
    %c0_i32 = arith.constant 0 : i32
    %c0_i32_0 = arith.constant 0 : i32
    %c0_i32_1 = arith.constant 0 : i32
    %c0_i32_2 = arith.constant 0 : i32
    return %c0_i32, %c0_i32_0, %c0_i32_1 : i32, i32, i32
  }
  func.func @transform_2(%arg0: i32) -> (i32, i32, i32) {
    %c0_i32 = arith.constant 0 : i32
    %c0_i32_0 = arith.constant 0 : i32
    %c0_i32_1 = arith.constant 0 : i32
    %c0_i32_2 = arith.constant 0 : i32
    return %c0_i32, %c0_i32_0, %c0_i32_1 : i32, i32, i32
  }
  func.func @transform_3(%arg0: i32) -> (i32, i32) {
    %c0_i32 = arith.constant 0 : i32
    %c0_i32_0 = arith.constant 0 : i32
    return %arg0, %c0_i32 : i32, i32
  }
}

</mosaic_0001>

<bundles_post_ra>
// kernel: resblock_forward.1
= control target key start
LH: loop header
LB: loop body
LE: loop exit
PB: predicated region body
PF: predicated region fallthrough
CT: control target
= control target key end

     0   :  { %8 = vsyncpa [#allocation3], 0  ;;  %s2769_s12 = smov [#allocation2]   ;;  %s3025_s0 = inlined_call_operand.vmem [shape: f32[32,128], index: 0, kind: input, shape index: {}]   ;;  %s3026_s1 = inlined_call_operand.hbm [shape: bf16[6,384,128], index: 1, kind: input, shape index: {}]   ;;  %s3027_s2 = inlined_call_operand.vmem [shape: f32[6,1,128], index: 2, kind: input, shape index: {}]   ;;  %s3028_s3 = inlined_call_operand.vmem [shape: f32[32,128], index: 3, kind: output, shape index: {}]  }
   0x1   :  { %s16_s13 = sshll.u32 %s2769_s12, 4  ;;  %s17_s13 = int_to_ptr.vmem [resolvable:$true] %s16_s13 }
   0x2   :  { %s2755_s14 = scalar_lea.vmem %s17_s13, 18432  ;;  %p2760_p1 = scmp.lt.s32.totalorder %s17_s13, %s17_s13 }
   0x3   :  { %p2756_p0 = scmp.ne.s32.totalorder %s17_s13, %s2755_s14  ;;  %p2761_p2 = scmp.lt.s32.totalorder %s2755_s14, %s2755_s14 }
   0x5   :  { %p2762_p3 = por %p2761_p2, %p2760_p1 }
   0x7   :  { %p2763_p4 = pnand %p2762_p3, %p2756_p0 }
   0x9   :  { %2766 = shalt.err (!%p2763_p4)
}
   0xa   :  { %s2770_s15 = smov 64   ;;  %s2771_s16 = smov 4  }
   0xb   :  { %22 = dma.hbm_to_vmem [thread:$0]  %s3026_s1, 18432, %s17_s13, [#allocation3], %s2770_s15, %s2770_s15, %s2771_s16  }
   0xc   :  { %2767 = dma.done.wait [#allocation3], 18432  }
   0xd   :  { %2768 = vsyncadd [#allocation3], 4294948864  ;;  %v2599_v0 = vld [vmem:[#allocation2 + $0x78] sm:$0xff]   ;;  %v2601_v2 = vld [vmem:[#allocation2 + $0x70] sm:$0xff]   ;;  %v33_v8 = vlaneseq }
   0xe   :  { %v2600_v1 = vld [vmem:[#allocation2 + $0x38] sm:$0xff]   ;;  %2248 = vmatprep.subr.bf16.mxu0 %v2599_v0  ;;  %v2603_v4 = vld [vmem:[#allocation2 + $0x30] sm:$0xff]   ;;  %v2604_v5 = vld [vmem:[#allocation2 + $0x68] sm:$0xff]  }
   0xf   :  { %2249 = vmatpush3.bf16.msra.mxu0 %v2600_v1  ;;  %v2602_v3 = vld [vmem:[#allocation2 + $0xb8] sm:$0xff]   ;;  %v2605_v6 = vld [vmem:[#allocation2 + $0xb0] sm:$0xff]   ;;  %v2606_v7 = vld [vmem:[#allocation2 + $0x28] sm:$0xff]   ;;  %v2795_v13 = vshrl.u32 %v33_v8, 7 }
  0x10   :  { %2250 = vmatprep.subr.bf16.mxu0 %v2601_v2  ;;  %2476 = vmatprep.subr.bf16.mxu1 %v2602_v3  ;;  %v2607_v9 = vld [vmem:[#allocation2 + $0x60] sm:$0xff]   ;;  %v2608_v10 = vld [vmem:[#allocation2 + $0xa8] sm:$0xff]   ;;  %v2610_v12 = vld [vmem:[#allocation2 + $0x58] sm:$0xff]  }
  0x11   :  { %2477 = vmatpush3.bf16.msra.mxu1 %v2602_v3  ;;  %v2609_v11 = vld [vmem:[#allocation2 + $0x20] sm:$0xff]   ;;  %v2612_v15 = vld [vmem:[#allocation2 + $0x18] sm:$0xff]   ;;  %v35_v17 = vadd.s32 8, %v2795_v13  ;;  %v2613_v18 = vld [vmem:[#allocation2 + $0x50] sm:$0xff]   ;;  %v42_v19 = vand.u32 15, %v2795_v13  ;;  %v37_v20 = vadd.s32 24, %v2795_v13 }
  0x12   :  { %2478 = vmatprep.subr.bf16.mxu1 %v2605_v6  ;;  %v2611_v14 = vld [vmem:[#allocation2 + $0xa0] sm:$0xff]   ;;  %v2614_v16 = vld [vmem:[#allocation2 + $0x98] sm:$0xff]   ;;  %v2615_v21 = vld [vmem:[#allocation2 + $0x10] sm:$0xff]   ;;  %v36_v22 = vadd.s32 16, %v2795_v13  ;;  %vm98_vm0 = vcmp.lt.s32.totalorder %v2795_v13, 1  ;;  %vm107_vm1 = vcmp.lt.s32.totalorder %v2795_v13, 7 }
  0x13   :  { %2251 = vmatpush3.bf16.msra.mxu0 %v2603_v4  ;;  %v2617_v23 = vld [vmem:[#allocation2 + $0x90] sm:$0xff]   ;;  %v49_v24 = vand.u32 15, %v35_v17  ;;  %v2616_v25 = vld [vmem:[#allocation2 + $0x48] sm:$0xff]   ;;  %v2619_v27 = vld [vmem:[#allocation2 + $0x40] sm:$0xff]   ;;  %vm2803_vm2 = vcmp.eq.s32.totalorder %v42_v19, 0  ;;  %v63_v34 = vand.u32 15, %v37_v20 }
  0x14   :  { %2252 = vmatprep.subr.bf16.mxu0 %v2604_v5  ;;  %v2618_v26 = vld [vmem:[#allocation2 + $0x8] sm:$0xff]   ;;  %v29_v30 = vld [vmem:[%s3025_s0] sm:$0xff]  ;;  %v32_v32 = vld [vmem:[%s3025_s0 + $0x18] sm:$0xff]  ;;  %v56_v35 = vand.u32 15, %v36_v22 }
  0x15   :  { %2479 = vmatpush3.bf16.msra.mxu1 %v2605_v6  ;;  %v2620_v28 = vld [vmem:[#allocation2 + $0x88] sm:$0xff]   ;;  %vm2816_vm3 = vcmp.eq.s32.totalorder %v49_v24, 15  ;;  %v94_v36 = vrot.slane %v29_v30, 7  ;;  %v103_v38 = vrot.slane %v29_v30, 1  ;;  %v2621_v40 = vld [vmem:[#allocation2] sm:$0xff]   ;;  %v97_v42 = vrot.slane %v32_v32, 7 }
  0x16   :  { %2480 = vmatprep.subr.bf16.mxu1 %v2608_v10  ;;  %v30_v31 = vld [vmem:[%s3025_s0 + $0x8] sm:$0xff]  ;;  %v31_v43 = vld [vmem:[%s3025_s0 + $0x10] sm:$0xff]  ;;  %v106_v44 = vrot.slane %v32_v32, 1  ;;  %v2622_v50 = vld [vmem:[#allocation2 + $0x80] sm:$0xff]   ;;  %vm2829_vm4 = vcmp.eq.s32.totalorder %v63_v34, 15  ;;  %vm2843_vm5 = vcmp.eq.s32.totalorder %v56_v35, 0 }
  0x17   :  { %2253 = vmatpush3.bf16.msra.mxu0 %v2606_v7  ;;  %v95_v37 = vrot.slane %v30_v31, 7  ;;  %v104_v39 = vrot.slane %v30_v31, 1  ;;  %v121_v41 = vpack.c.bf16 %v30_v31, %v29_v30  ;;  %v105_v46 = vrot.slane %v31_v43, 1  ;;  %v2623_v56 = vld [vmem:[#allocation2 + $0x138] sm:$0xff]   ;;  %v2626_v6 = vld [vmem:[#allocation2 + $0x130] sm:$0xff]   ;;  %v2641_v22 = vld [vmem:[#allocation2 + $0x108] sm:$0xff]  }
  0x18   :  { %2254 = vmatprep.subr.bf16.mxu0 %v2607_v9  ;;  %v96_v47 = vrot.slane %v31_v43, 7  ;;  %v102_v49 = vsel %vm98_vm0, %v97_v42, %v94_v36  ;;  %v111_v52 = vsel %vm107_vm1, %v106_v44, %v103_v38  ;;  %v2624_v59 = vld [vmem:[#allocation2 + $0x178] sm:$0xff]   ;;  %v124_v1 = vpack.c.bf16 %v32_v32, %v31_v43  ;;  %v2627_v7 = vld [vmem:[#allocation2 + $0x170] sm:$0xff]   ;;  %v2629_v9 = vld [vmem:[#allocation2 + $0x128] sm:$0xff]  }
  0x19   :  { %2481 = vmatpush3.bf16.msra.mxu1 %v2608_v10  ;;  %v110_v45 = vsel %vm107_vm1, %v103_v38, %v104_v39  ;;  %v101_v48 = vsel %vm98_vm0, %v94_v36, %v95_v37  ;;  %357 = vmatprep.mubr.bf16.mxu0 %v121_v41  ;;  %v109_v54 = vsel %vm107_vm1, %v104_v39, %v105_v46  ;;  %v2625_v0 = vld [vmem:[#allocation2 + $0xf8] sm:$0xff]   ;;  %v2628_v8 = vld [vmem:[#allocation2 + $0xf0] sm:$0xff]   ;;  %v2630_v10 = vld [vmem:[#allocation2 + $0x168] sm:$0xff]  }
  0x1a   :  { %2482 = vmatprep.subr.bf16.mxu1 %v2611_v14  ;;  %v112_v53 = vsel %vm2803_vm2, %v110_v45, %v102_v49  ;;  %v99_v55 = vsel %vm98_vm0, %v96_v47, %v97_v42  ;;  %v117_v57 = vsel %vm2816_vm3, %v101_v48, %v109_v54  ;;  %v108_v62 = vsel %vm107_vm1, %v105_v46, %v106_v44  ;;  %v2636_v17 = vld [vmem:[#allocation2 + $0x158] sm:$0xff]   ;;  %v2638_v19 = vld [vmem:[#allocation2 + $0x110] sm:$0xff]   ;;  %v2643_v24 = vld [vmem:[#allocation2 + $0xc8] sm:$0xff]  }
  0x1b   :  { %2255 = vmatpush3.bf16.msra.mxu0 %v2609_v11  ;;  %v120_v60 = vpack.c.bf16 %v101_v48, %v112_v53  ;;  %v122_v61 = vpack.c.bf16 %v117_v57, %v110_v45  ;;  %v119_v63 = vsel %vm2829_vm4, %v99_v55, %v111_v52  ;;  %v100_v2 = vsel %vm98_vm0, %v95_v37, %v96_v47  ;;  %v2631_v11 = vld [vmem:[#allocation2 + $0xe8] sm:$0xff]   ;;  %v2639_v20 = vld [vmem:[#allocation2 + $0x150] sm:$0xff]   ;;  %v2855_v30 = vld [vmem:[#allocation2 + $0x238] sm:$0xff]  }
  0x1c   :  { %2256 = vmatprep.subr.bf16.mxu0 %v2610_v12  ;;  %v125_v3 = vpack.c.bf16 %v119_v63, %v108_v62  ;;  %v114_v4 = vsel %vm2843_vm5, %v108_v62, %v100_v2  ;;  %v2632_v12 = vld [vmem:[#allocation2 + $0x120] sm:$0xff]  }
  0x1d   :  { %2483 = vmatpush3.bf16.msra.mxu1 %v2611_v14  ;;  %2492 = vmatprep.mubr.bf16.mxu1 %v122_v61  ;;  %v123_v5 = vpack.c.bf16 %v99_v55, %v114_v4  ;;  %v2633_v14 = vld [vmem:[#allocation2 + $0x160] sm:$0xff]  }
  0x1e   :  { %2484 = vmatprep.subr.bf16.mxu1 %v2614_v16  ;;  %v2093_v36 = vld [vmem:[%s3027_s2] ss:$0 sm:$0xff]  ;;  %v2223_v51 = vld [vmem:[%s3027_s2 + $0x5] ss:$0 sm:$0xff] }
  0x1f   :  { %2257 = vmatpush3.bf16.msra.mxu0 %v2612_v15  ;;  %v2634_v15 = vld [vmem:[#allocation2 + $0xe0] sm:$0xff]  }
  0x20   :  { %2258 = vmatprep.subr.bf16.mxu0 %v2613_v18  ;;  %v2637_v18 = vld [vmem:[#allocation2 + $0xd8] sm:$0xff]   ;;  %v2743_v58 = vld [vmem:[%s3025_s0] sm:$0xff] }
  0x21   :  { %2485 = vmatpush3.bf16.msra.mxu1 %v2614_v16  ;;  %v2635_v16 = vld [vmem:[#allocation2 + $0x118] sm:$0xff]  }
  0x22   :  { %2486 = vmatprep.subr.bf16.mxu1 %v2617_v23 }
  0x23   :  { %2259 = vmatpush3.bf16.msra.mxu0 %v2615_v21  ;;  %v2640_v21 = vld [vmem:[#allocation2 + $0xd0] sm:$0xff]  }
  0x24   :  { %2260 = vmatprep.subr.bf16.mxu0 %v2616_v25  ;;  %v2644_v25 = vld [vmem:[#allocation2 + $0x100] sm:$0xff]  }
  0x25   :  { %2487 = vmatpush3.bf16.msra.mxu1 %v2617_v23  ;;  %v2642_v23 = vld [vmem:[#allocation2 + $0x148] sm:$0xff]  }
  0x26   :  { %2488 = vmatprep.subr.bf16.mxu1 %v2620_v28 }
  0x27   :  { %2261 = vmatpush3.bf16.msra.mxu0 %v2618_v26  ;;  %v2645_v26 = vld [vmem:[#allocation2 + $0x140] sm:$0xff]  }
  0x28   :  { %2262 = vmatprep.subr.bf16.mxu0 %v2619_v27  ;;  %v2646_v27 = vld [vmem:[#allocation2 + $0xc0] sm:$0xff]  }
  0x29   :  { %2489 = vmatpush3.bf16.msra.mxu1 %v2620_v28  ;;  %v2647_v28 = vld [vmem:[#allocation2 + $0x1f8] sm:$0xff]  }
  0x2a   :  { %2490 = vmatprep.subr.bf16.mxu1 %v2622_v50 }
  0x2b   :  { %2263 = vmatpush3.bf16.msra.mxu0 %v2621_v40 }
  0x2c   :  { %2286 = vmatprep.subr.bf16.mxu0 %v2623_v56 }
  0x2d   :  { %2491 = vmatpush3.bf16.msra.mxu1 %v2622_v50 }
  0x2e   :  { %358 = vmatmul.mubr.bf16.vlgmr.msra.gmra.mxu0 %v120_v60  ;;  %2496 = vmatprep.subr.bf16.mxu1 %v2624_v59 }
  0x2f   :  { %365 = vmatprep.mubr.bf16.mxu0 %v124_v1  ;;  %2287 = vmatpush3.bf16.msra.mxu0 %v2625_v0 }
  0x30   :  { %2493 = vmatmul.mubr.bf16.vlgmr.msra.gmra.mxu1 %v125_v3  ;;  %2288 = vmatprep.subr.bf16.mxu0 %v2626_v6 }
  0x31   :  { %2497 = vmatpush3.bf16.msra.mxu1 %v2624_v59 }
  0x32   :  { %2498 = vmatprep.subr.bf16.mxu1 %v2627_v7 }
  0x33   :  { %2289 = vmatpush3.bf16.msra.mxu0 %v2628_v8 }
  0x34   :  { %2290 = vmatprep.subr.bf16.mxu0 %v2629_v9 }
  0x35   :  { %2499 = vmatpush3.bf16.msra.mxu1 %v2627_v7 }
  0x36   :  { %366 = vmatmul.mubr.bf16.gmra.mxu0 %v123_v5  ;;  %2500 = vmatprep.subr.bf16.mxu1 %v2630_v10 }
  0x37   :  { %2291 = vmatpush3.bf16.msra.mxu0 %v2631_v11 }
  0x38   :  { %2292 = vmatprep.subr.bf16.mxu0 %v2632_v12 }
  0x39   :  { %2501 = vmatpush3.bf16.msra.mxu1 %v2630_v10 }
  0x3a   :  { %2502 = vmatprep.subr.bf16.mxu1 %v2633_v14 }
  0x3b   :  { %2293 = vmatpush3.bf16.msra.mxu0 %v2634_v15 }
  0x3c   :  { %2294 = vmatprep.subr.bf16.mxu0 %v2635_v16 }
  0x3d   :  { %2503 = vmatpush3.bf16.msra.mxu1 %v2633_v14 }
  0x3e   :  { %2504 = vmatprep.subr.bf16.mxu1 %v2636_v17 }
  0x3f   :  { %2295 = vmatpush3.bf16.msra.mxu0 %v2637_v18 }
  0x40   :  { %2296 = vmatprep.subr.bf16.mxu0 %v2638_v19 }
  0x41   :  { %2505 = vmatpush3.bf16.msra.mxu1 %v2636_v17 }
  0x42   :  { %2506 = vmatprep.subr.bf16.mxu1 %v2639_v20 }
  0x43   :  { %2297 = vmatpush3.bf16.msra.mxu0 %v2640_v21 }
  0x44   :  { %2298 = vmatprep.subr.bf16.mxu0 %v2641_v22 }
  0x45   :  { %2507 = vmatpush3.bf16.msra.mxu1 %v2639_v20  ;;  %v2649_v20 = vld [vmem:[#allocation2 + $0x1b8] sm:$0xff]  }
  0x46   :  { %2508 = vmatprep.subr.bf16.mxu1 %v2642_v23 }
  0x47   :  { %2299 = vmatpush3.bf16.msra.mxu0 %v2643_v24 }
  0x48   :  { %2300 = vmatprep.subr.bf16.mxu0 %v2644_v25  ;;  %v2651_v25 = vld [vmem:[#allocation2 + $0x230] sm:$0xff]  }
  0x49   :  { %2509 = vmatpush3.bf16.msra.mxu1 %v2642_v23  ;;  %v2650_v23 = vld [vmem:[#allocation2 + $0x1f0] sm:$0xff]  }
  0x4a   :  { %2510 = vmatprep.subr.bf16.mxu1 %v2645_v26 }
  0x4b   :  { %2301 = vmatpush3.bf16.msra.mxu0 %v2646_v27 }
  0x4c   :  { %2324 = vmatprep.subr.bf16.mxu0 %v2647_v28 }
  0x4d   :  { %2511 = vmatpush3.bf16.msra.mxu1 %v2645_v26 }
  0x4e   :  { %2516 = vmatprep.subr.bf16.mxu1 %v2855_v30 }
  0xee   :  { %v2264_v31 = vpop.f32.mrf.mxu0 }
  0xf0   :  { %v2265_v32 = vpop.f32.mrf.mxu0  ;;  %v2494_v35 = vpop.f32.mrf.mxu1 }
  0xf1   :  { %v2266_v34 = vadd.f32 %v2265_v32, %v2264_v31  ;;  %v2652_v31 = vld [vmem:[#allocation2 + $0x1b0] sm:$0xff]   ;;  %v2653_v32 = vld [vmem:[#allocation2 + $0x1e8] sm:$0xff]  }
  0xf2   :  { %v2267_v37 = vpop.f32.mrf.mxu0  ;;  %v408_v38 = vpop.f32.mrf.mxu1 }
  0xf3   :  { %v360_v40 = vadd.f32 %v2266_v34, %v2093_v36  ;;  %v2654_v34 = vld [vmem:[#allocation2 + $0x228] sm:$0xff]  }
  0xf4   :  { %v2268_v39 = vpop.f32.mrf.mxu0  ;;  %v2495_v42 = vpop.f32.mrf.mxu1 }
  0xf5   :  { %v2269_v41 = vadd.f32 %v2268_v39, %v2267_v37  ;;  %v409_v46 = vadd.f32 %v408_v38, %v360_v40  ;;  %v2657_v37 = vld [vmem:[#allocation2 + $0x220] sm:$0xff]   ;;  %v2659_v38 = vld [vmem:[#allocation2 + $0x1d8] sm:$0xff]  }
  0xf6   :  { %v2270_v43 = vpop.f32.mrf.mxu0  ;;  %v411_v45 = vpop.f32.mrf.mxu1  ;;  %v2660_v39 = vld [vmem:[#allocation2 + $0x218] sm:$0xff]  }
  0xf7   :  { %v363_v44 = vadd.f32 %v2269_v41, %v2093_v36  ;;  %v423_v54 = vmax.f32 %v409_v46, 0.0  ;;  %v2661_v40 = vld [vmem:[#allocation2 + $0x198] sm:$0xff]   ;;  %v2662_v41 = vld [vmem:[#allocation2 + $0x1d0] sm:$0xff]   ;;  %v2667_v46 = vld [vmem:[#allocation2 + $0x188] sm:$0xff]  }
  0xf8   :  { %v2271_v47 = vpop.f32.mrf.mxu0 }
  0xf9   :  { %v2272_v48 = vadd.f32 %v2271_v47, %v2270_v43  ;;  %v412_v49 = vadd.f32 %v411_v45, %v363_v44  ;;  %v427_v0 = vrot.slane %v423_v54, 7  ;;  %v435_v3 = vrot.slane %v423_v54, 1  ;;  %v2664_v43 = vld [vmem:[#allocation2 + $0x190] sm:$0xff]   ;;  %v2665_v44 = vld [vmem:[#allocation2 + $0x1c8] sm:$0xff]   ;;  %v2668_v47 = vld [vmem:[#allocation2 + $0x1c0] sm:$0xff]  }
  0xfa   :  { %v2273_v50 = vpop.f32.mrf.mxu0  ;;  %v2666_v45 = vld [vmem:[#allocation2 + $0x208] sm:$0xff]  }
  0xfb   :  { %v368_v52 = vadd.f32 %v2272_v48, %v2093_v36  ;;  %v424_v53 = vmax.f32 %v412_v49, 0.0  ;;  %v2669_v48 = vld [vmem:[#allocation2 + $0x200] sm:$0xff]  }
  0xfc   :  { %v2274_v55 = vpop.f32.mrf.mxu0  ;;  %v2670_v49 = vld [vmem:[#allocation2 + $0x180] sm:$0xff]  }
  0xfd   :  { %v417_v56 = vadd.f32 %v2494_v35, %v368_v52  ;;  %v2275_v57 = vadd.f32 %v2274_v55, %v2273_v50  ;;  %v452_v59 = vpack.c.bf16 %v424_v53, %v423_v54  ;;  %v428_v61 = vrot.slane %v424_v53, 7  ;;  %v2655_v35 = vld [vmem:[#allocation2 + $0x1a8] sm:$0xff]   ;;  %v2671_v50 = vld [vmem:[#allocation2 + $0x2b8] sm:$0xff]  }
  0xfe   :  { %v436_v63 = vrot.slane %v424_v53, 1  ;;  %v2672_v52 = vld [vmem:[#allocation2 + $0x2f8] sm:$0xff]  }
  0xff   :  { %v425_v60 = vmax.f32 %v417_v56, 0.0  ;;  %v371_v62 = vadd.f32 %v2275_v57, %v2093_v36  ;;  %690 = vmatprep.mubr.bf16.mxu0 %v452_v59  ;;  %v433_v5 = vsel %vm98_vm0, %v427_v0, %v428_v61  ;;  %v2656_v36 = vld [vmem:[#allocation2 + $0x1e0] sm:$0xff]  }
 0x100   :  { %v441_v7 = vsel %vm107_vm1, %v435_v3, %v436_v63  ;;  %v2119_v59 = vld [vmem:[%s3027_s2 + $0x1] ss:$0 sm:$0xff] }
 0x101   :  { %v437_v1 = vrot.slane %v425_v60, 1  ;;  %v420_v2 = vadd.f32 %v2495_v42, %v371_v62  ;;  %v429_v9 = vrot.slane %v425_v60, 7  ;;  %v2663_v42 = vld [vmem:[#allocation2 + $0x210] sm:$0xff]  }
 0x103   :  { %v426_v4 = vmax.f32 %v420_v2, 0.0  ;;  %v440_v6 = vsel %vm107_vm1, %v436_v63, %v437_v1  ;;  %v432_v26 = vsel %vm98_vm0, %v428_v61, %v429_v9 }
 0x104   :  { %v448_v8 = vsel %vm2816_vm3, %v433_v5, %v440_v6 }
 0x105   :  { %v430_v10 = vrot.slane %v426_v4, 7  ;;  %v438_v11 = vrot.slane %v426_v4, 1  ;;  %v453_v12 = vpack.c.bf16 %v448_v8, %v441_v7  ;;  %v455_v24 = vpack.c.bf16 %v426_v4, %v425_v60 }
 0x107   :  { %v434_v14 = vsel %vm98_vm0, %v430_v10, %v427_v0  ;;  %2512 = vmatprep.mubr.bf16.mxu1 %v453_v12  ;;  %v431_v15 = vsel %vm98_vm0, %v429_v9, %v430_v10  ;;  %v439_v16 = vsel %vm107_vm1, %v437_v1, %v438_v11  ;;  %v442_v17 = vsel %vm107_vm1, %v438_v11, %v435_v3 }
 0x108   :  { %v443_v18 = vsel %vm2803_vm2, %v441_v7, %v434_v14  ;;  %v450_v19 = vsel %vm2829_vm4, %v431_v15, %v442_v17  ;;  %v445_v27 = vsel %vm2843_vm5, %v439_v16, %v432_v26 }
 0x109   :  { %v451_v21 = vpack.c.bf16 %v433_v5, %v443_v18  ;;  %v456_v22 = vpack.c.bf16 %v450_v19, %v439_v16  ;;  %v454_v28 = vpack.c.bf16 %v431_v15, %v445_v27 }
 0x10b   :  { %691 = vmatmul.mubr.bf16.vlgmr.msra.gmra.mxu0 %v451_v21  ;;  %2513 = vmatmul.mubr.bf16.vlgmr.msra.gmra.mxu1 %v456_v22 }
 0x10c   :  { %698 = vmatprep.mubr.bf16.mxu0 %v455_v24  ;;  %2325 = vmatpush3.bf16.msra.mxu0 %v2649_v20 }
 0x10d   :  { %2517 = vmatpush3.bf16.msra.mxu1 %v2855_v30  ;;  %2326 = vmatprep.subr.bf16.mxu0 %v2650_v23  ;;  %v2658_v30 = vld [vmem:[#allocation2 + $0x1a0] sm:$0xff]  }
 0x10e   :  { %2518 = vmatprep.subr.bf16.mxu1 %v2651_v25 }
 0x110   :  { %2327 = vmatpush3.bf16.msra.mxu0 %v2652_v31 }
 0x111   :  { %2519 = vmatpush3.bf16.msra.mxu1 %v2651_v25  ;;  %2328 = vmatprep.subr.bf16.mxu0 %v2653_v32 }
 0x112   :  { %2520 = vmatprep.subr.bf16.mxu1 %v2654_v34 }
 0x113   :  { %699 = vmatmul.mubr.bf16.gmra.mxu0 %v454_v28 }
 0x114   :  { %2329 = vmatpush3.bf16.msra.mxu0 %v2655_v35 }
 0x115   :  { %2521 = vmatpush3.bf16.msra.mxu1 %v2654_v34  ;;  %2330 = vmatprep.subr.bf16.mxu0 %v2656_v36 }
 0x116   :  { %2522 = vmatprep.subr.bf16.mxu1 %v2657_v37 }
 0x118   :  { %2331 = vmatpush3.bf16.msra.mxu0 %v2658_v30 }
 0x119   :  { %2523 = vmatpush3.bf16.msra.mxu1 %v2657_v37  ;;  %2332 = vmatprep.subr.bf16.mxu0 %v2659_v38  ;;  %v2673_v38 = vld [vmem:[#allocation2 + $0x278] sm:$0xff]  }
 0x11a   :  { %2524 = vmatprep.subr.bf16.mxu1 %v2660_v39 }
 0x11c   :  { %2333 = vmatpush3.bf16.msra.mxu0 %v2661_v40 }
 0x11d   :  { %2525 = vmatpush3.bf16.msra.mxu1 %v2660_v39  ;;  %2334 = vmatprep.subr.bf16.mxu0 %v2662_v41 }
 0x11e   :  { %2526 = vmatprep.subr.bf16.mxu1 %v2663_v42 }
 0x120   :  { %2335 = vmatpush3.bf16.msra.mxu0 %v2664_v43 }
 0x121   :  { %2527 = vmatpush3.bf16.msra.mxu1 %v2663_v42  ;;  %2336 = vmatprep.subr.bf16.mxu0 %v2665_v44 }
 0x122   :  { %2528 = vmatprep.subr.bf16.mxu1 %v2666_v45 }
 0x124   :  { %2337 = vmatpush3.bf16.msra.mxu0 %v2667_v46  ;;  %v2675_v46 = vld [vmem:[#allocation2 + $0x2f0] sm:$0xff]  }
 0x125   :  { %2529 = vmatpush3.bf16.msra.mxu1 %v2666_v45  ;;  %2338 = vmatprep.subr.bf16.mxu0 %v2668_v47  ;;  %v2674_v45 = vld [vmem:[#allocation2 + $0x2b0] sm:$0xff]  }
 0x126   :  { %2530 = vmatprep.subr.bf16.mxu1 %v2669_v48  ;;  %v2676_v47 = vld [vmem:[#allocation2 + $0x270] sm:$0xff]  }
 0x128   :  { %2339 = vmatpush3.bf16.msra.mxu0 %v2670_v49  ;;  %v2678_v49 = vld [vmem:[#allocation2 + $0x2e8] sm:$0xff]  }
 0x129   :  { %2531 = vmatpush3.bf16.msra.mxu1 %v2669_v48  ;;  %2362 = vmatprep.subr.bf16.mxu0 %v2671_v50  ;;  %v2677_v48 = vld [vmem:[#allocation2 + $0x2a8] sm:$0xff]  }
 0x12a   :  { %2536 = vmatprep.subr.bf16.mxu1 %v2672_v52  ;;  %v2679_v50 = vld [vmem:[#allocation2 + $0x268] sm:$0xff]  }
 0x1cb   :  { %v2302_v53 = vpop.f32.mrf.mxu0  ;;  %v2514_v54 = vpop.f32.mrf.mxu1 }
 0x1cd   :  { %v2303_v55 = vpop.f32.mrf.mxu0  ;;  %v741_v56 = vpop.f32.mrf.mxu1 }
 0x1ce   :  { %v2304_v57 = vadd.f32 %v2303_v55, %v2302_v53  ;;  %v2681_v53 = vld [vmem:[#allocation2 + $0x2e0] sm:$0xff]   ;;  %v2683_v55 = vld [vmem:[#allocation2 + $0x298] sm:$0xff]  }
 0x1cf   :  { %v2305_v60 = vpop.f32.mrf.mxu0  ;;  %v2515_v61 = vpop.f32.mrf.mxu1 }
 0x1d0   :  { %v693_v63 = vadd.f32 %v2304_v57, %v2119_v59  ;;  %v2685_v57 = vld [vmem:[#allocation2 + $0x258] sm:$0xff]  }
 0x1d1   :  { %v2306_v62 = vpop.f32.mrf.mxu0  ;;  %v744_v3 = vpop.f32.mrf.mxu1 }
 0x1d2   :  { %v2307_v0 = vadd.f32 %v2306_v62, %v2305_v60  ;;  %v742_v5 = vadd.f32 %v741_v56, %v693_v63  ;;  %v2684_v56 = vld [vmem:[#allocation2 + $0x2d8] sm:$0xff]   ;;  %v2687_v60 = vld [vmem:[#allocation2 + $0x2d0] sm:$0xff]   ;;  %v2689_v62 = vld [vmem:[#allocation2 + $0x288] sm:$0xff]  }
 0x1d3   :  { %v2308_v1 = vpop.f32.mrf.mxu0  ;;  %v2690_v63 = vld [vmem:[#allocation2 + $0x2c8] sm:$0xff]  }
 0x1d4   :  { %v696_v2 = vadd.f32 %v2307_v0, %v2119_v59  ;;  %v756_v17 = vrot.slane %v742_v5, 7  ;;  %v764_v20 = vrot.slane %v742_v5, 1  ;;  %v2691_v0 = vld [vmem:[#allocation2 + $0x248] sm:$0xff]  }
 0x1d5   :  { %v2309_v4 = vpop.f32.mrf.mxu0 }
 0x1d6   :  { %v745_v6 = vadd.f32 %v744_v3, %v696_v2  ;;  %v2310_v7 = vadd.f32 %v2309_v4, %v2308_v1  ;;  %v2692_v1 = vld [vmem:[#allocation2 + $0x280] sm:$0xff]   ;;  %v2695_v4 = vld [vmem:[#allocation2 + $0x378] sm:$0xff]  }
 0x1d7   :  { %v2311_v8 = vpop.f32.mrf.mxu0  ;;  %v2693_v2 = vld [vmem:[#allocation2 + $0x2c0] sm:$0xff]  }
 0x1d8   :  { %v701_v9 = vadd.f32 %v2310_v7, %v2119_v59  ;;  %v781_v10 = vpack.c.bf16 %v745_v6, %v742_v5  ;;  %v757_v12 = vrot.slane %v745_v6, 7  ;;  %v765_v16 = vrot.slane %v745_v6, 1  ;;  %v2694_v3 = vld [vmem:[#allocation2 + $0x240] sm:$0xff]   ;;  %v2913_v5 = vld [vmem:[#allocation2 + $0x3b8] sm:$0xff]  }
 0x1d9   :  { %v2312_v11 = vpop.f32.mrf.mxu0 }
 0x1da   :  { %v750_v14 = vadd.f32 %v2514_v54, %v701_v9  ;;  %v2313_v15 = vadd.f32 %v2312_v11, %v2311_v8  ;;  %1019 = vmatprep.mubr.bf16.mxu0 %v781_v10  ;;  %v762_v22 = vsel %vm98_vm0, %v756_v17, %v757_v12  ;;  %v770_v24 = vsel %vm107_vm1, %v764_v20, %v765_v16  ;;  %v2682_v54 = vld [vmem:[#allocation2 + $0x260] sm:$0xff]  }
 0x1db   :  { %v2145_v11 = vld [vmem:[%s3027_s2 + $0x2] ss:$0 sm:$0xff] }
 0x1dc   :  { %v766_v18 = vrot.slane %v750_v14, 1  ;;  %v704_v19 = vadd.f32 %v2313_v15, %v2119_v59  ;;  %v758_v26 = vrot.slane %v750_v14, 7  ;;  %v2686_v59 = vld [vmem:[#allocation2 + $0x290] sm:$0xff]  }
 0x1de   :  { %v753_v21 = vadd.f32 %v2515_v61, %v704_v19  ;;  %v769_v23 = vsel %vm107_vm1, %v765_v16, %v766_v18  ;;  %v761_v42 = vsel %vm98_vm0, %v757_v12, %v758_v26  ;;  %v2688_v61 = vld [vmem:[#allocation2 + $0x250] sm:$0xff]  }
 0x1df   :  { %v777_v25 = vsel %vm2816_vm3, %v762_v22, %v769_v23 }
 0x1e0   :  { %v759_v27 = vrot.slane %v753_v21, 7  ;;  %v767_v28 = vrot.slane %v753_v21, 1  ;;  %v782_v31 = vpack.c.bf16 %v777_v25, %v770_v24  ;;  %v784_v41 = vpack.c.bf16 %v753_v21, %v750_v14 }
 0x1e2   :  { %v763_v32 = vsel %vm98_vm0, %v759_v27, %v756_v17  ;;  %2532 = vmatprep.mubr.bf16.mxu1 %v782_v31  ;;  %v760_v34 = vsel %vm98_vm0, %v758_v26, %v759_v27  ;;  %v768_v35 = vsel %vm107_vm1, %v766_v18, %v767_v28  ;;  %v771_v36 = vsel %vm107_vm1, %v767_v28, %v764_v20 }
 0x1e3   :  { %v772_v37 = vsel %vm2803_vm2, %v770_v24, %v763_v32  ;;  %v779_v30 = vsel %vm2829_vm4, %v760_v34, %v771_v36  ;;  %v774_v43 = vsel %vm2843_vm5, %v768_v35, %v761_v42 }
 0x1e4   :  { %v780_v39 = vpack.c.bf16 %v762_v22, %v772_v37  ;;  %v785_v40 = vpack.c.bf16 %v779_v30, %v768_v35  ;;  %v783_v44 = vpack.c.bf16 %v760_v34, %v774_v43 }
 0x1e6   :  { %1020 = vmatmul.mubr.bf16.vlgmr.msra.gmra.mxu0 %v780_v39  ;;  %2533 = vmatmul.mubr.bf16.vlgmr.msra.gmra.mxu1 %v785_v40 }
 0x1e7   :  { %1027 = vmatprep.mubr.bf16.mxu0 %v784_v41  ;;  %2363 = vmatpush3.bf16.msra.mxu0 %v2673_v38 }
 0x1e8   :  { %2537 = vmatpush3.bf16.msra.mxu1 %v2672_v52  ;;  %2364 = vmatprep.subr.bf16.mxu0 %v2674_v45  ;;  %v2680_v52 = vld [vmem:[#allocation2 + $0x2a0] sm:$0xff]  }
 0x1e9   :  { %2538 = vmatprep.subr.bf16.mxu1 %v2675_v46 }
 0x1eb   :  { %2365 = vmatpush3.bf16.msra.mxu0 %v2676_v47 }
 0x1ec   :  { %2539 = vmatpush3.bf16.msra.mxu1 %v2675_v46  ;;  %2366 = vmatprep.subr.bf16.mxu0 %v2677_v48 }
 0x1ed   :  { %2540 = vmatprep.subr.bf16.mxu1 %v2678_v49 }
 0x1ee   :  { %1028 = vmatmul.mubr.bf16.gmra.mxu0 %v783_v44 }
 0x1ef   :  { %2367 = vmatpush3.bf16.msra.mxu0 %v2679_v50 }
 0x1f0   :  { %2541 = vmatpush3.bf16.msra.mxu1 %v2678_v49  ;;  %2368 = vmatprep.subr.bf16.mxu0 %v2680_v52 }
 0x1f1   :  { %2542 = vmatprep.subr.bf16.mxu1 %v2681_v53 }
 0x1f3   :  { %2369 = vmatpush3.bf16.msra.mxu0 %v2682_v54 }
 0x1f4   :  { %2543 = vmatpush3.bf16.msra.mxu1 %v2681_v53  ;;  %2370 = vmatprep.subr.bf16.mxu0 %v2683_v55 }
 0x1f5   :  { %2544 = vmatprep.subr.bf16.mxu1 %v2684_v56 }
 0x1f7   :  { %2371 = vmatpush3.bf16.msra.mxu0 %v2685_v57 }
 0x1f8   :  { %2545 = vmatpush3.bf16.msra.mxu1 %v2684_v56  ;;  %2372 = vmatprep.subr.bf16.mxu0 %v2686_v59 }
 0x1f9   :  { %2546 = vmatprep.subr.bf16.mxu1 %v2687_v60 }
 0x1fb   :  { %2373 = vmatpush3.bf16.msra.mxu0 %v2688_v61 }
 0x1fc   :  { %2547 = vmatpush3.bf16.msra.mxu1 %v2687_v60  ;;  %2374 = vmatprep.subr.bf16.mxu0 %v2689_v62  ;;  %v2697_v60 = vld [vmem:[#allocation2 + $0x338] sm:$0xff]  }
 0x1fd   :  { %2548 = vmatprep.subr.bf16.mxu1 %v2690_v63 }
 0x1ff   :  { %2375 = vmatpush3.bf16.msra.mxu0 %v2691_v0 }
 0x200   :  { %2549 = vmatpush3.bf16.msra.mxu1 %v2690_v63  ;;  %2376 = vmatprep.subr.bf16.mxu0 %v2692_v1  ;;  %v2698_v63 = vld [vmem:[#allocation2 + $0x370] sm:$0xff]  }
 0x201   :  { %2550 = vmatprep.subr.bf16.mxu1 %v2693_v2  ;;  %v2699_v1 = vld [vmem:[#allocation2 + $0x3b0] sm:$0xff]  }
 0x203   :  { %2377 = vmatpush3.bf16.msra.mxu0 %v2694_v3 }
 0x204   :  { %2551 = vmatpush3.bf16.msra.mxu1 %v2693_v2  ;;  %2400 = vmatprep.subr.bf16.mxu0 %v2695_v4 }
 0x205   :  { %2556 = vmatprep.subr.bf16.mxu1 %v2913_v5 }
 0x2a6   :  { %v2340_v6 = vpop.f32.mrf.mxu0  ;;  %v2534_v7 = vpop.f32.mrf.mxu1 }
 0x2a8   :  { %v2341_v8 = vpop.f32.mrf.mxu0  ;;  %v1070_v9 = vpop.f32.mrf.mxu1 }
 0x2a9   :  { %v2342_v10 = vadd.f32 %v2341_v8, %v2340_v6  ;;  %v2700_v6 = vld [vmem:[#allocation2 + $0x330] sm:$0xff]   ;;  %v2702_v8 = vld [vmem:[#allocation2 + $0x3a8] sm:$0xff]  }
 0x2aa   :  { %v2343_v12 = vpop.f32.mrf.mxu0  ;;  %v2535_v15 = vpop.f32.mrf.mxu1 }
 0x2ab   :  { %v1022_v14 = vadd.f32 %v2342_v10, %v2145_v11  ;;  %v2704_v10 = vld [vmem:[#allocation2 + $0x360] sm:$0xff]  }
 0x2ac   :  { %v2344_v16 = vpop.f32.mrf.mxu0  ;;  %v1073_v21 = vpop.f32.mrf.mxu1 }
 0x2ad   :  { %v2345_v17 = vadd.f32 %v2344_v16, %v2343_v12  ;;  %v1071_v20 = vadd.f32 %v1070_v9, %v1022_v14  ;;  %v2703_v9 = vld [vmem:[#allocation2 + $0x328] sm:$0xff]   ;;  %v2707_v12 = vld [vmem:[#allocation2 + $0x358] sm:$0xff]   ;;  %v2710_v16 = vld [vmem:[#allocation2 + $0x350] sm:$0xff]  }
 0x2ae   :  { %v2346_v18 = vpop.f32.mrf.mxu0  ;;  %v2708_v14 = vld [vmem:[#allocation2 + $0x398] sm:$0xff]  }
 0x2af   :  { %v1025_v19 = vadd.f32 %v2345_v17, %v2145_v11  ;;  %v1085_v28 = vmax.f32 %v1071_v20, 0.0  ;;  %v2711_v17 = vld [vmem:[#allocation2 + $0x390] sm:$0xff]   ;;  %v2714_v20 = vld [vmem:[#allocation2 + $0x388] sm:$0xff]  }
 0x2b0   :  { %v2347_v22 = vpop.f32.mrf.mxu0 }
 0x2b1   :  { %v1074_v23 = vadd.f32 %v1073_v21, %v1025_v19  ;;  %v2348_v24 = vadd.f32 %v2347_v22, %v2346_v18  ;;  %v1089_v39 = vrot.slane %v1085_v28, 7  ;;  %v1097_v42 = vrot.slane %v1085_v28, 1  ;;  %v2712_v18 = vld [vmem:[#allocation2 + $0x310] sm:$0xff]   ;;  %v2713_v19 = vld [vmem:[#allocation2 + $0x348] sm:$0xff]   ;;  %v2716_v22 = vld [vmem:[#allocation2 + $0x340] sm:$0xff]  }
 0x2b2   :  { %v2349_v25 = vpop.f32.mrf.mxu0  ;;  %v2715_v21 = vld [vmem:[#allocation2 + $0x308] sm:$0xff]  }
 0x2b3   :  { %v1086_v26 = vmax.f32 %v1074_v23, 0.0  ;;  %v1030_v27 = vadd.f32 %v2348_v24, %v2145_v11  ;;  %v2717_v23 = vld [vmem:[#allocation2 + $0x380] sm:$0xff]  }
 0x2b4   :  { %v2350_v31 = vpop.f32.mrf.mxu0  ;;  %v2718_v24 = vld [vmem:[#allocation2 + $0x300] sm:$0xff]  }
 0x2b5   :  { %v1079_v32 = vadd.f32 %v2534_v7, %v1030_v27  ;;  %v2351_v34 = vadd.f32 %v2350_v31, %v2349_v25  ;;  %v1114_v35 = vpack.c.bf16 %v1086_v26, %v1085_v28  ;;  %v1090_v36 = vrot.slane %v1086_v26, 7  ;;  %v2701_v7 = vld [vmem:[#allocation2 + $0x368] sm:$0xff]   ;;  %v2719_v25 = vld [vmem:[#allocation2 + $0x438] sm:$0xff]  }
 0x2b6   :  { %v1098_v38 = vrot.slane %v1086_v26, 1  ;;  %v2720_v26 = vld [vmem:[#allocation2 + $0x478] sm:$0xff]  }
 0x2b7   :  { %v1087_v37 = vmax.f32 %v1079_v32, 0.0  ;;  %v1033_v30 = vadd.f32 %v2351_v34, %v2145_v11  ;;  %1352 = vmatprep.mubr.bf16.mxu0 %v1114_v35  ;;  %v1095_v44 = vsel %vm98_vm0, %v1089_v39, %v1090_v36  ;;  %v2705_v11 = vld [vmem:[#allocation2 + $0x3a0] sm:$0xff]  }
 0x2b8   :  { %v1103_v46 = vsel %vm107_vm1, %v1097_v42, %v1098_v38  ;;  %v2171_v35 = vld [vmem:[%s3027_s2 + $0x3] ss:$0 sm:$0xff] }
 0x2b9   :  { %v1099_v40 = vrot.slane %v1087_v37, 1  ;;  %v1082_v41 = vadd.f32 %v2535_v15, %v1033_v30  ;;  %v1091_v48 = vrot.slane %v1087_v37, 7  ;;  %v2709_v15 = vld [vmem:[#allocation2 + $0x318] sm:$0xff]  }
 0x2bb   :  { %v1088_v43 = vmax.f32 %v1082_v41, 0.0  ;;  %v1102_v45 = vsel %vm107_vm1, %v1098_v38, %v1099_v40  ;;  %v1094_v2 = vsel %vm98_vm0, %v1090_v36, %v1091_v48 }
 0x2bc   :  { %v1110_v47 = vsel %vm2816_vm3, %v1095_v44, %v1102_v45 }
 0x2bd   :  { %v1092_v49 = vrot.slane %v1088_v43, 7  ;;  %v1100_v50 = vrot.slane %v1088_v43, 1  ;;  %v1115_v52 = vpack.c.bf16 %v1110_v47, %v1103_v46  ;;  %v1117_v0 = vpack.c.bf16 %v1088_v43, %v1087_v37 }
 0x2bf   :  { %v1096_v53 = vsel %vm98_vm0, %v1092_v49, %v1089_v39  ;;  %2552 = vmatprep.mubr.bf16.mxu1 %v1115_v52  ;;  %v1093_v54 = vsel %vm98_vm0, %v1091_v48, %v1092_v49  ;;  %v1101_v55 = vsel %vm107_vm1, %v1099_v40, %v1100_v50  ;;  %v1104_v56 = vsel %vm107_vm1, %v1100_v50, %v1097_v42 }
 0x2c0   :  { %v1105_v57 = vsel %vm2803_vm2, %v1103_v46, %v1096_v53  ;;  %v1112_v59 = vsel %vm2829_vm4, %v1093_v54, %v1104_v56  ;;  %v1107_v3 = vsel %vm2843_vm5, %v1101_v55, %v1094_v2 }
 0x2c1   :  { %v1113_v61 = vpack.c.bf16 %v1095_v44, %v1105_v57  ;;  %v1118_v62 = vpack.c.bf16 %v1112_v59, %v1101_v55  ;;  %v1116_v4 = vpack.c.bf16 %v1093_v54, %v1107_v3 }
 0x2c3   :  { %1353 = vmatmul.mubr.bf16.vlgmr.msra.gmra.mxu0 %v1113_v61  ;;  %2553 = vmatmul.mubr.bf16.vlgmr.msra.gmra.mxu1 %v1118_v62 }
 0x2c4   :  { %1360 = vmatprep.mubr.bf16.mxu0 %v1117_v0  ;;  %2401 = vmatpush3.bf16.msra.mxu0 %v2697_v60 }
 0x2c5   :  { %2557 = vmatpush3.bf16.msra.mxu1 %v2913_v5  ;;  %2402 = vmatprep.subr.bf16.mxu0 %v2698_v63  ;;  %v2706_v5 = vld [vmem:[#allocation2 + $0x320] sm:$0xff]  }
 0x2c6   :  { %2558 = vmatprep.subr.bf16.mxu1 %v2699_v1 }
 0x2c8   :  { %2403 = vmatpush3.bf16.msra.mxu0 %v2700_v6 }
 0x2c9   :  { %2559 = vmatpush3.bf16.msra.mxu1 %v2699_v1  ;;  %2404 = vmatprep.subr.bf16.mxu0 %v2701_v7 }
 0x2ca   :  { %2560 = vmatprep.subr.bf16.mxu1 %v2702_v8 }
 0x2cb   :  { %1361 = vmatmul.mubr.bf16.gmra.mxu0 %v1116_v4 }
 0x2cc   :  { %2405 = vmatpush3.bf16.msra.mxu0 %v2703_v9 }
 0x2cd   :  { %2561 = vmatpush3.bf16.msra.mxu1 %v2702_v8  ;;  %2406 = vmatprep.subr.bf16.mxu0 %v2704_v10 }
 0x2ce   :  { %2562 = vmatprep.subr.bf16.mxu1 %v2705_v11 }
 0x2d0   :  { %2407 = vmatpush3.bf16.msra.mxu0 %v2706_v5 }
 0x2d1   :  { %2563 = vmatpush3.bf16.msra.mxu1 %v2705_v11  ;;  %2408 = vmatprep.subr.bf16.mxu0 %v2707_v12  ;;  %v2721_v12 = vld [vmem:[#allocation2 + $0x3f8] sm:$0xff]  }
 0x2d2   :  { %2564 = vmatprep.subr.bf16.mxu1 %v2708_v14 }
 0x2d4   :  { %2409 = vmatpush3.bf16.msra.mxu0 %v2709_v15 }
 0x2d5   :  { %2565 = vmatpush3.bf16.msra.mxu1 %v2708_v14  ;;  %2410 = vmatprep.subr.bf16.mxu0 %v2710_v16 }
 0x2d6   :  { %2566 = vmatprep.subr.bf16.mxu1 %v2711_v17 }
 0x2d8   :  { %2411 = vmatpush3.bf16.msra.mxu0 %v2712_v18 }
 0x2d9   :  { %2567 = vmatpush3.bf16.msra.mxu1 %v2711_v17  ;;  %2412 = vmatprep.subr.bf16.mxu0 %v2713_v19 }
 0x2da   :  { %2568 = vmatprep.subr.bf16.mxu1 %v2714_v20 }
 0x2dc   :  { %2413 = vmatpush3.bf16.msra.mxu0 %v2715_v21  ;;  %v2723_v21 = vld [vmem:[#allocation2 + $0x470] sm:$0xff]  }
 0x2dd   :  { %2569 = vmatpush3.bf16.msra.mxu1 %v2714_v20  ;;  %2414 = vmatprep.subr.bf16.mxu0 %v2716_v22  ;;  %v2722_v20 = vld [vmem:[#allocation2 + $0x430] sm:$0xff]  }
 0x2de   :  { %2570 = vmatprep.subr.bf16.mxu1 %v2717_v23  ;;  %v2724_v22 = vld [vmem:[#allocation2 + $0x3f0] sm:$0xff]  }
 0x2e0   :  { %2415 = vmatpush3.bf16.msra.mxu0 %v2718_v24  ;;  %v2726_v24 = vld [vmem:[#allocation2 + $0x468] sm:$0xff]  }
 0x2e1   :  { %2571 = vmatpush3.bf16.msra.mxu1 %v2717_v23  ;;  %2438 = vmatprep.subr.bf16.mxu0 %v2719_v25  ;;  %v2725_v23 = vld [vmem:[#allocation2 + $0x428] sm:$0xff]  }
 0x2e2   :  { %2576 = vmatprep.subr.bf16.mxu1 %v2720_v26  ;;  %v2727_v25 = vld [vmem:[#allocation2 + $0x3e8] sm:$0xff]  }
 0x383   :  { %v2378_v27 = vpop.f32.mrf.mxu0  ;;  %v2554_v28 = vpop.f32.mrf.mxu1 }
 0x385   :  { %v2379_v31 = vpop.f32.mrf.mxu0  ;;  %v1403_v32 = vpop.f32.mrf.mxu1 }
 0x386   :  { %v2380_v34 = vadd.f32 %v2379_v31, %v2378_v27  ;;  %v2729_v27 = vld [vmem:[#allocation2 + $0x460] sm:$0xff]   ;;  %v2731_v31 = vld [vmem:[#allocation2 + $0x418] sm:$0xff]  }
 0x387   :  { %v2381_v36 = vpop.f32.mrf.mxu0  ;;  %v2555_v37 = vpop.f32.mrf.mxu1 }
 0x388   :  { %v1355_v38 = vadd.f32 %v2380_v34, %v2171_v35  ;;  %v2733_v34 = vld [vmem:[#allocation2 + $0x3d8] sm:$0xff]  }
 0x389   :  { %v2382_v30 = vpop.f32.mrf.mxu0  ;;  %v1406_v42 = vpop.f32.mrf.mxu1 }
 0x38a   :  { %v2383_v39 = vadd.f32 %v2382_v30, %v2381_v36  ;;  %v1404_v44 = vadd.f32 %v1403_v32, %v1355_v38  ;;  %v2732_v32 = vld [vmem:[#allocation2 + $0x458] sm:$0xff]   ;;  %v2735_v36 = vld [vmem:[#allocation2 + $0x450] sm:$0xff]   ;;  %v2737_v30 = vld [vmem:[#allocation2 + $0x408] sm:$0xff]  }
 0x38b   :  { %v2384_v40 = vpop.f32.mrf.mxu0  ;;  %v2738_v38 = vld [vmem:[#allocation2 + $0x448] sm:$0xff]  }
 0x38c   :  { %v1358_v41 = vadd.f32 %v2383_v39, %v2171_v35  ;;  %v1418_v56 = vrot.slane %v1404_v44, 7  ;;  %v1426_v60 = vrot.slane %v1404_v44, 1  ;;  %v2739_v39 = vld [vmem:[#allocation2 + $0x3c8] sm:$0xff]  }
 0x38d   :  { %v2385_v43 = vpop.f32.mrf.mxu0 }
 0x38e   :  { %v1407_v45 = vadd.f32 %v1406_v42, %v1358_v41  ;;  %v2386_v46 = vadd.f32 %v2385_v43, %v2384_v40  ;;  %v2740_v40 = vld [vmem:[#allocation2 + $0x400] sm:$0xff]  }
 0x38f   :  { %v2387_v47 = vpop.f32.mrf.mxu0  ;;  %v2741_v41 = vld [vmem:[#allocation2 + $0x440] sm:$0xff]  }
 0x390   :  { %v1363_v48 = vadd.f32 %v2386_v46, %v2171_v35  ;;  %v1443_v49 = vpack.c.bf16 %v1407_v45, %v1404_v44  ;;  %v1419_v52 = vrot.slane %v1407_v45, 7  ;;  %v1427_v55 = vrot.slane %v1407_v45, 1  ;;  %v2742_v42 = vld [vmem:[#allocation2 + $0x3c0] sm:$0xff]  }
 0x391   :  { %v2388_v50 = vpop.f32.mrf.mxu0 }
 0x392   :  { %v1412_v53 = vadd.f32 %v2554_v28, %v1363_v48  ;;  %v2389_v54 = vadd.f32 %v2388_v50, %v2387_v47  ;;  %1681 = vmatprep.mubr.bf16.mxu0 %v1443_v49  ;;  %v1424_v62 = vsel %vm98_vm0, %v1418_v56, %v1419_v52  ;;  %v1432_v0 = vsel %vm107_vm1, %v1426_v60, %v1427_v55  ;;  %v2730_v28 = vld [vmem:[#allocation2 + $0x3e0] sm:$0xff]  }
 0x393   :  { %v2197_v48 = vld [vmem:[%s3027_s2 + $0x4] ss:$0 sm:$0xff] }
 0x394   :  { %v1428_v57 = vrot.slane %v1412_v53, 1  ;;  %v1366_v59 = vadd.f32 %v2389_v54, %v2171_v35  ;;  %v1420_v2 = vrot.slane %v1412_v53, 7  ;;  %v2734_v35 = vld [vmem:[#allocation2 + $0x410] sm:$0xff]  }
 0x396   :  { %v1415_v61 = vadd.f32 %v2555_v37, %v1366_v59  ;;  %v1431_v63 = vsel %vm107_vm1, %v1427_v55, %v1428_v57  ;;  %v1423_v17 = vsel %vm98_vm0, %v1419_v52, %v1420_v2  ;;  %v2736_v37 = vld [vmem:[#allocation2 + $0x3d0] sm:$0xff]  }
 0x397   :  { %v1439_v1 = vsel %vm2816_vm3, %v1424_v62, %v1431_v63 }
 0x398   :  { %v1421_v3 = vrot.slane %v1415_v61, 7  ;;  %v1429_v4 = vrot.slane %v1415_v61, 1  ;;  %v1444_v6 = vpack.c.bf16 %v1439_v1, %v1432_v0  ;;  %v1446_v16 = vpack.c.bf16 %v1415_v61, %v1412_v53 }
 0x39a   :  { %v1425_v7 = vsel %vm98_vm0, %v1421_v3, %v1418_v56  ;;  %2572 = vmatprep.mubr.bf16.mxu1 %v1444_v6  ;;  %v1422_v8 = vsel %vm98_vm0, %v1420_v2, %v1421_v3  ;;  %v1430_v9 = vsel %vm107_vm1, %v1428_v57, %v1429_v4  ;;  %v1433_v10 = vsel %vm107_vm1, %v1429_v4, %v1426_v60 }
 0x39b   :  { %v1434_v11 = vsel %vm2803_vm2, %v1432_v0, %v1425_v7  ;;  %v1441_v5 = vsel %vm2829_vm4, %v1422_v8, %v1433_v10  ;;  %v1436_v18 = vsel %vm2843_vm5, %v1430_v9, %v1423_v17 }
 0x39c   :  { %v1442_v14 = vpack.c.bf16 %v1424_v62, %v1434_v11  ;;  %v1447_v15 = vpack.c.bf16 %v1441_v5, %v1430_v9  ;;  %v1445_v19 = vpack.c.bf16 %v1422_v8, %v1436_v18 }
 0x39e   :  { %1682 = vmatmul.mubr.bf16.vlgmr.msra.gmra.mxu0 %v1442_v14  ;;  %2573 = vmatmul.mubr.bf16.vlgmr.msra.gmra.mxu1 %v1447_v15 }
 0x39f   :  { %1689 = vmatprep.mubr.bf16.mxu0 %v1446_v16  ;;  %2439 = vmatpush3.bf16.msra.mxu0 %v2721_v12 }
 0x3a0   :  { %2577 = vmatpush3.bf16.msra.mxu1 %v2720_v26  ;;  %2440 = vmatprep.subr.bf16.mxu0 %v2722_v20  ;;  %v2728_v26 = vld [vmem:[#allocation2 + $0x420] sm:$0xff]  }
 0x3a1   :  { %2578 = vmatprep.subr.bf16.mxu1 %v2723_v21 }
 0x3a3   :  { %2441 = vmatpush3.bf16.msra.mxu0 %v2724_v22 }
 0x3a4   :  { %2579 = vmatpush3.bf16.msra.mxu1 %v2723_v21  ;;  %2442 = vmatprep.subr.bf16.mxu0 %v2725_v23 }
 0x3a5   :  { %2580 = vmatprep.subr.bf16.mxu1 %v2726_v24 }
 0x3a6   :  { %1690 = vmatmul.mubr.bf16.gmra.mxu0 %v1445_v19 }
 0x3a7   :  { %2443 = vmatpush3.bf16.msra.mxu0 %v2727_v25 }
 0x3a8   :  { %2581 = vmatpush3.bf16.msra.mxu1 %v2726_v24  ;;  %2444 = vmatprep.subr.bf16.mxu0 %v2728_v26 }
 0x3a9   :  { %2582 = vmatprep.subr.bf16.mxu1 %v2729_v27 }
 0x3ab   :  { %2445 = vmatpush3.bf16.msra.mxu0 %v2730_v28 }
 0x3ac   :  { %2583 = vmatpush3.bf16.msra.mxu1 %v2729_v27  ;;  %2446 = vmatprep.subr.bf16.mxu0 %v2731_v31 }
 0x3ad   :  { %2584 = vmatprep.subr.bf16.mxu1 %v2732_v32 }
 0x3af   :  { %2447 = vmatpush3.bf16.msra.mxu0 %v2733_v34 }
 0x3b0   :  { %2585 = vmatpush3.bf16.msra.mxu1 %v2732_v32  ;;  %2448 = vmatprep.subr.bf16.mxu0 %v2734_v35 }
 0x3b1   :  { %2586 = vmatprep.subr.bf16.mxu1 %v2735_v36 }
 0x3b3   :  { %2449 = vmatpush3.bf16.msra.mxu0 %v2736_v37 }
 0x3b4   :  { %2587 = vmatpush3.bf16.msra.mxu1 %v2735_v36  ;;  %2450 = vmatprep.subr.bf16.mxu0 %v2737_v30 }
 0x3b5   :  { %2588 = vmatprep.subr.bf16.mxu1 %v2738_v38 }
 0x3b7   :  { %2451 = vmatpush3.bf16.msra.mxu0 %v2739_v39 }
 0x3b8   :  { %2589 = vmatpush3.bf16.msra.mxu1 %v2738_v38  ;;  %2452 = vmatprep.subr.bf16.mxu0 %v2740_v40 }
 0x3b9   :  { %2590 = vmatprep.subr.bf16.mxu1 %v2741_v41 }
 0x3bb   :  { %2453 = vmatpush3.bf16.msra.mxu0 %v2742_v42 }
 0x3bc   :  { %2591 = vmatpush3.bf16.msra.mxu1 %v2741_v41 }
 0x45e   :  { %v2416_v43 = vpop.f32.mrf.mxu0  ;;  %v2574_v44 = vpop.f32.mrf.mxu1 }
 0x460   :  { %v2417_v45 = vpop.f32.mrf.mxu0  ;;  %v1732_v46 = vpop.f32.mrf.mxu1 }
 0x461   :  { %v2418_v47 = vadd.f32 %v2417_v45, %v2416_v43 }
 0x462   :  { %v2419_v49 = vpop.f32.mrf.mxu0  ;;  %v2575_v52 = vpop.f32.mrf.mxu1 }
 0x463   :  { %v1684_v50 = vadd.f32 %v2418_v47, %v2197_v48 }
 0x464   :  { %v2420_v53 = vpop.f32.mrf.mxu0  ;;  %v1735_v59 = vpop.f32.mrf.mxu1 }
 0x465   :  { %v2421_v54 = vadd.f32 %v2420_v53, %v2419_v49  ;;  %v1733_v57 = vadd.f32 %v1732_v46, %v1684_v50 }
 0x466   :  { %v2422_v55 = vpop.f32.mrf.mxu0 }
 0x467   :  { %v1687_v56 = vadd.f32 %v2421_v54, %v2197_v48  ;;  %v1747_v2 = vmax.f32 %v1733_v57, 0.0 }
 0x468   :  { %v2423_v60 = vpop.f32.mrf.mxu0 }
 0x469   :  { %v1736_v61 = vadd.f32 %v1735_v59, %v1687_v56  ;;  %v2424_v62 = vadd.f32 %v2423_v60, %v2422_v55  ;;  %v1751_v5 = vrot.slane %v1747_v2, 7  ;;  %v1759_v15 = vrot.slane %v1747_v2, 1  ;;  %v2744_v56 = vld [vmem:[%s3025_s0 + $0x8] sm:$0xff] }
 0x46a   :  { %v2425_v63 = vpop.f32.mrf.mxu0 }
 0x46b   :  { %v1748_v0 = vmax.f32 %v1736_v61, 0.0  ;;  %v1692_v1 = vadd.f32 %v2424_v62, %v2197_v48 }
 0x46c   :  { %v2426_v3 = vpop.f32.mrf.mxu0 }
 0x46d   :  { %v1741_v4 = vadd.f32 %v2574_v44, %v1692_v1  ;;  %v2427_v6 = vadd.f32 %v2426_v3, %v2425_v63  ;;  %v1776_v7 = vpack.c.bf16 %v1748_v0, %v1747_v2  ;;  %v1752_v8 = vrot.slane %v1748_v0, 7  ;;  %v2745_v63 = vld [vmem:[%s3025_s0 + $0x10] sm:$0xff]  ;;  %v2746_v3 = vld [vmem:[%s3025_s0 + $0x18] sm:$0xff] }
 0x46e   :  { %v1760_v11 = vrot.slane %v1748_v0, 1 }
 0x46f   :  { %v1749_v9 = vmax.f32 %v1741_v4, 0.0  ;;  %v1695_v10 = vadd.f32 %v2427_v6, %v2197_v48  ;;  %2014 = vmatprep.mubr.bf16.mxu0 %v1776_v7  ;;  %v1757_v17 = vsel %vm98_vm0, %v1751_v5, %v1752_v8 }
 0x470   :  { %v1765_v19 = vsel %vm107_vm1, %v1759_v15, %v1760_v11 }
 0x471   :  { %v1761_v12 = vrot.slane %v1749_v9, 1  ;;  %v1744_v14 = vadd.f32 %v2575_v52, %v1695_v10  ;;  %v1753_v21 = vrot.slane %v1749_v9, 7 }
 0x473   :  { %v1750_v16 = vmax.f32 %v1744_v14, 0.0  ;;  %v1764_v18 = vsel %vm107_vm1, %v1760_v11, %v1761_v12  ;;  %v1756_v36 = vsel %vm98_vm0, %v1752_v8, %v1753_v21 }
 0x474   :  { %v1772_v20 = vsel %vm2816_vm3, %v1757_v17, %v1764_v18 }
 0x475   :  { %v1754_v22 = vrot.slane %v1750_v16, 7  ;;  %v1762_v23 = vrot.slane %v1750_v16, 1  ;;  %v1777_v24 = vpack.c.bf16 %v1772_v20, %v1765_v19  ;;  %v1779_v35 = vpack.c.bf16 %v1750_v16, %v1749_v9 }
 0x477   :  { %v1758_v25 = vsel %vm98_vm0, %v1754_v22, %v1751_v5  ;;  %2592 = vmatprep.mubr.bf16.mxu1 %v1777_v24  ;;  %v1755_v26 = vsel %vm98_vm0, %v1753_v21, %v1754_v22  ;;  %v1763_v27 = vsel %vm107_vm1, %v1761_v12, %v1762_v23  ;;  %v1766_v28 = vsel %vm107_vm1, %v1762_v23, %v1759_v15 }
 0x478   :  { %v1767_v33 = vsel %vm2803_vm2, %v1765_v19, %v1758_v25  ;;  %v1774_v31 = vsel %vm2829_vm4, %v1755_v26, %v1766_v28  ;;  %v1769_v37 = vsel %vm2843_vm5, %v1763_v27, %v1756_v36 }
 0x479   :  { %v1775_v32 = vpack.c.bf16 %v1757_v17, %v1767_v33  ;;  %v1780_v34 = vpack.c.bf16 %v1774_v31, %v1763_v27  ;;  %v1778_v30 = vpack.c.bf16 %v1755_v26, %v1769_v37 }
 0x47b   :  { %2015 = vmatmul.mubr.bf16.vlgmr.msra.gmra.mxu0 %v1775_v32  ;;  %2593 = vmatmul.mubr.bf16.vlgmr.msra.gmra.mxu1 %v1780_v34 }
 0x47c   :  { %2022 = vmatprep.mubr.bf16.mxu0 %v1779_v35 }
 0x483   :  { %2023 = vmatmul.mubr.bf16.gmra.mxu0 %v1778_v30 }
 0x53b   :  { %v2454_v38 = vpop.f32.mrf.mxu0  ;;  %v2594_v29 = vpop.f32.mrf.mxu1 }
 0x53d   :  { %v2455_v39 = vpop.f32.mrf.mxu0  ;;  %v2065_v40 = vpop.f32.mrf.mxu1 }
 0x53e   :  { %v2456_v41 = vadd.f32 %v2455_v39, %v2454_v38 }
 0x53f   :  { %v2457_v42 = vpop.f32.mrf.mxu0  ;;  %v2595_v44 = vpop.f32.mrf.mxu1 }
 0x540   :  { %v2017_v43 = vadd.f32 %v2456_v41, %v2223_v51 }
 0x541   :  { %v2458_v45 = vpop.f32.mrf.mxu0  ;;  %v2068_v50 = vpop.f32.mrf.mxu1 }
 0x542   :  { %v2066_v13 = vadd.f32 %v2065_v40, %v2017_v43  ;;  %v2459_v46 = vadd.f32 %v2458_v45, %v2457_v42 }
 0x543   :  { %v2460_v47 = vpop.f32.mrf.mxu0 }
 0x544   :  { %v2080_v48 = vadd.f32 %v2743_v58, %v2066_v13  ;;  %v2020_v49 = vadd.f32 %v2459_v46, %v2223_v51 }
 0x545   :  { %v2461_v52 = vpop.f32.mrf.mxu0 }
 0x546   :  { %2084 = vst [vmem:[%s3028_s3] sm:$0xff] %v2080_v48  ;;  %v2069_v53 = vadd.f32 %v2068_v50, %v2020_v49  ;;  %v2462_v54 = vadd.f32 %v2461_v52, %v2460_v47 }
 0x547   :  { %v2463_v55 = vpop.f32.mrf.mxu0 }
 0x548   :  { %v2081_v57 = vadd.f32 %v2744_v56, %v2069_v53  ;;  %v2025_v59 = vadd.f32 %v2462_v54, %v2223_v51 }
 0x549   :  { %v2464_v60 = vpop.f32.mrf.mxu0 }
 0x54a   :  { %2085 = vst [vmem:[%s3028_s3 + $0x8] sm:$0xff] %v2081_v57  ;;  %v2074_v61 = vadd.f32 %v2594_v29, %v2025_v59  ;;  %v2465_v62 = vadd.f32 %v2464_v60, %v2463_v55 }
 0x54c   :  { %v2082_v0 = vadd.f32 %v2745_v63, %v2074_v61  ;;  %v2028_v1 = vadd.f32 %v2465_v62, %v2223_v51 }
 0x54e   :  { %2086 = vst [vmem:[%s3028_s3 + $0x10] sm:$0xff] %v2082_v0  ;;  %v2077_v2 = vadd.f32 %v2595_v44, %v2028_v1 }
 0x550   :  { %v2083_v4 = vadd.f32 %v2746_v3, %v2077_v2 }
 0x552   :  { %2087 = vst [vmem:[%s3028_s3 + $0x18] sm:$0xff] %v2083_v4 }
 0x553   :  { %2092 = vsyncpa [#allocation3], 1 }

</bundles_post_ra>
